<compile_context>
chip_gen: v7x
topology: tpu7x:2x2x1
jax: 0.10.0
libtpu: 0.0.40
codegen_flags: <defaults>
</compile_context>

<pallas_src>
import functools

import jax
import jax.numpy as jnp
from jax.experimental import pallas as pl
from jax.experimental.pallas import tpu as pltpu


def _round_up(x, m):
    return ((x + m - 1) // m) * m


def _linear_exp_kernel_single_k(x_ref, w_ref, o_ref):
    # Whole K in one block: no accumulator read-modify-write, no pl.when phases.
    o_ref[...] = jnp.exp(
        jnp.dot(x_ref[...], w_ref[...], preferred_element_type=jnp.float32)
    ).astype(o_ref.dtype)


def _linear_exp_kernel_multi_k(x_ref, w_ref, o_ref, acc_ref):
    @pl.when(pl.program_id(2) == 0)
    def _():
        acc_ref[...] = jnp.zeros_like(acc_ref)

    # [tm, tk] @ [tk, tn]: contraction dims are (last, first), the MXU-native
    # orientation, so Mosaic emits no weight-tile transpose / relayout.
    acc_ref[...] += jnp.dot(
        x_ref[...], w_ref[...], preferred_element_type=jnp.float32
    )

    @pl.when(pl.program_id(2) == pl.num_programs(2) - 1)
    def _():
        # exp epilogue on the EUP, fused with the final cast + store.
        o_ref[...] = jnp.exp(acc_ref[...]).astype(o_ref.dtype)


@functools.partial(jax.jit, static_argnames=("tm", "tn", "tk"))
def linear_exp(state, weight, *, tm=512, tn=512, tk=2048):
    """exp(state @ weight.T), matching torch.exp(nn.Linear(bias=False)(state)).

    state:  [batch, input_size]
    weight: [output_size, input_size]  (PyTorch nn.Linear layout)
    """
    M, K = state.shape
    N, K_w = weight.shape
    assert K == K_w

    in_bytes = jnp.dtype(state.dtype).itemsize
    out_bytes = in_bytes

    # ---- generation-aware VMEM budget -------------------------------------
    try:
        vmem_cap = pltpu.get_tpu_info().vmem_capacity_bytes
    except Exception:
        vmem_cap = 64 * 1024 * 1024  # smallest per-TC VMEM across v5e/v6e/v7x
    budget = int(0.70 * vmem_cap)

    def _footprint(bm, bn, bk):
        # double-buffered x & w tiles + double-buffered out tile + f32 accumulator
        return (2 * (bm * bk + bk * bn) * in_bytes
                + 2 * bm * bn * out_bytes
                + bm * bn * 4)

    # Shrink K first (cheapest: only adds reduction steps), then N, then M.
    # All shrunk values stay multiples of 128 / 8, so BlockSpec rules hold.
    while _footprint(tm, tn, tk) > budget and tk > 512:
        tk //= 2
    while _footprint(tm, tn, tk) > budget and tn > 256:
        tn //= 2
    while _footprint(tm, tn, tk) > budget and tm > 256:
        tm //= 2

    # ---- clamp tiles to the problem (full-dim blocks satisfy (8,128) rule) --
    tm = min(tm, M)
    tn = min(tn, N)
    tk = min(tk, K)

    grid_m = pl.cdiv(M, tm)
    grid_n = pl.cdiv(N, tn)

    # v7x has 2 TensorCores and only "parallel" axes shard across them: make
    # sure there are >= 2 parallel blocks when the problem allows it.
    if grid_m * grid_n < 2 and N > 128:
        tn = max(128, _round_up(pl.cdiv(N, 2), 128))
        grid_n = pl.cdiv(N, tn)

    # ---- K handling: the reduction axis must never see garbage -------------
    # One-time transpose of the nn.Linear weight to [K, N]. This is the only
    # per-call weight copy (no M/N padding copies); callers that own the
    # parameter can pre-transpose it once and skip this entirely.
    single_k = tk >= K
    if single_k:
        tk = K
        k_pad = K
        x = state
        w_t = weight.T                      # [K, N]
    else:
        k_pad = _round_up(K, tk)
        pad_k = k_pad - K
        x = jnp.pad(state, ((0, 0), (0, pad_k))) if pad_k else state
        w_p = jnp.pad(weight, ((0, 0), (0, pad_k))) if pad_k else weight
        w_t = w_p.T                         # [k_pad, N]; zero K-pad -> exact dot
    grid_k = k_pad // tk

    out_shape = jax.ShapeDtypeStruct((M, N), state.dtype)
    vmem_limit = int(min(budget + (8 << 20), int(0.9 * vmem_cap)))
    cost = pl.CostEstimate(
        flops=2 * M * N * k_pad,
        transcendentals=M * N,
        bytes_accessed=(grid_n * M * k_pad + grid_m * k_pad * N) * in_bytes
        + M * N * out_bytes,
    )

    if grid_k == 1:
        # 2-D grid, no K axis, no scratch accumulator.
        return pl.pallas_call(
            _linear_exp_kernel_single_k,
            out_shape=out_shape,
            grid_spec=pltpu.PrefetchScalarGridSpec(
                num_scalar_prefetch=0,
                grid=(grid_m, grid_n),
                in_specs=[
                    pl.BlockSpec((tm, tk), lambda i, j: (i, 0)),   # x tile
                    pl.BlockSpec((tk, tn), lambda i, j: (0, j)),   # w.T tile
                ],
                out_specs=pl.BlockSpec((tm, tn), lambda i, j: (i, j)),
            ),
            compiler_params=pltpu.CompilerParams(
                dimension_semantics=("parallel", "parallel"),
                vmem_limit_bytes=vmem_limit,
            ),
            cost_estimate=cost,
        )(x, w_t)

    return pl.pallas_call(
        _linear_exp_kernel_multi_k,
        out_shape=out_shape,
        grid_spec=pltpu.PrefetchScalarGridSpec(
            num_scalar_prefetch=0,
            grid=(grid_m, grid_n, grid_k),
            in_specs=[
                pl.BlockSpec((tm, tk), lambda i, j, k: (i, k)),    # x tile
                pl.BlockSpec((tk, tn), lambda i, j, k: (k, j)),    # w.T tile
            ],
            out_specs=pl.BlockSpec((tm, tn), lambda i, j, k: (i, j)),
            scratch_shapes=[pltpu.VMEM((tm, tn), jnp.float32)],
        ),
        compiler_params=pltpu.CompilerParams(
            # K (reduction) axis last and "arbitrary"; M/N parallel so v7x can
            # shard blocks across its 2 TensorCores.
            dimension_semantics=("parallel", "parallel", "arbitrary"),
            vmem_limit_bytes=vmem_limit,
        ),
        cost_estimate=cost,
    )(x, w_t)


if __name__ == "__main__":
    key = jax.random.PRNGKey(0)
    k_x, k_w = jax.random.split(key)

    batch = 8
    input_size = 32
    output_size = 16

    # Deterministic synthetic params for nn.Linear(input_size, output_size, bias=False)
    state = jax.random.normal(k_x, (batch, input_size), dtype=jnp.float32)
    weight = jax.random.normal(k_w, (output_size, input_size), dtype=jnp.float32) * 0.1

    out = linear_exp(state, weight)
    jax.block_until_ready(out)

    # Sanity check against plain-JAX reference
    ref = jnp.exp(state @ weight.T)
    assert out.shape == (batch, output_size)
    assert jnp.allclose(out, ref, rtol=1e-5, atol=1e-5)

    print("KERNEL_OK")
</pallas_src>

<mosaic_0001>
module attributes {stable_mosaic.version = 11 : i64} {
  func.func @_linear_exp_kernel_single_k(%arg0: i32, %arg1: i32, %arg2: memref<8x32xf32, #tpu.memory_space<vmem>>, %arg3: memref<32x16xf32, #tpu.memory_space<vmem>>, %arg4: memref<8x16xf32, #tpu.memory_space<vmem>>) attributes {dimension_semantics = [#tpu.dimension_semantics<parallel>, #tpu.dimension_semantics<parallel>], iteration_bounds = array<i64: 1, 1>, scalar_prefetch = 0 : i64, scratch_operands = 0 : i64, tpu.core_type = #tpu.core_type<tc>, window_params = [{transform_indices = @transform_0, window_bounds = array<i64: 8, 32>}, {transform_indices = @transform_1, window_bounds = array<i64: 32, 16>}, {transform_indices = @transform_2, window_bounds = array<i64: 8, 16>}]} {
    %c0 = arith.constant 0 : index
    %c0_0 = arith.constant 0 : index
    %0 = vector.load %arg2[%c0, %c0_0] : memref<8x32xf32, #tpu.memory_space<vmem>>, vector<8x32xf32>
    %c0_1 = arith.constant 0 : index
    %c0_2 = arith.constant 0 : index
    %1 = vector.load %arg3[%c0_1, %c0_2] : memref<32x16xf32, #tpu.memory_space<vmem>>, vector<32x16xf32>
    %cst = arith.constant dense<0.000000e+00> : vector<8x16xf32>
    %2 = tpu.matmul %0, %1, %cst {dimension_numbers = #tpu.dot_dimension_numbers<[1], [0], [0], [1], [0, 0, 1, 1], [], []>} : vector<8x32xf32>, vector<32x16xf32>, vector<8x16xf32> -> vector<8x16xf32>
    %3 = math.exp %2 : vector<8x16xf32>
    %c0_3 = arith.constant 0 : index
    %c0_4 = arith.constant 0 : index
    %4 = vector.load %arg4[%c0_3, %c0_4] : memref<8x16xf32, #tpu.memory_space<vmem>>, vector<8x16xf32>
    tpu.vector_store %arg4[%c0_3, %c0_4], %3 {strides = array<i32>} : memref<8x16xf32, #tpu.memory_space<vmem>>, vector<8x16xf32>,
    return
  }
  func.func @transform_0(%arg0: i32, %arg1: i32) -> (i32, i32) {
    %c0_i32 = arith.constant 0 : i32
    %c0_i32_0 = arith.constant 0 : i32
    return %arg0, %c0_i32 : i32, i32
  }
  func.func @transform_1(%arg0: i32, %arg1: i32) -> (i32, i32) {
    %c0_i32 = arith.constant 0 : i32
    %c0_i32_0 = arith.constant 0 : i32
    return %c0_i32, %arg1 : i32, i32
  }
  func.func @transform_2(%arg0: i32, %arg1: i32) -> (i32, i32) {
    %c0_i32 = arith.constant 0 : i32
    return %arg0, %arg1 : i32, i32
  }
}

</mosaic_0001>

<bundles_post_ra>
// kernel: linear_exp.1
= control target key start
LH: loop header
LB: loop body
LE: loop exit
PB: predicated region body
PF: predicated region fallthrough
CT: control target
= control target key end

     0   :  { %v162_v3 = vmov 0.0|0.0   ;;  %vm163_vm0 = vmmov 0   ;;  %v164_v6 = vmov 0.0   ;;  %s208_s0 = inlined_call_operand.vmem [shape: f32[8,32], index: 0, kind: input, shape index: {}]   ;;  %s209_s1 = inlined_call_operand.vmem [shape: f32[32,16], index: 1, kind: input, shape index: {}]   ;;  %s210_s2 = inlined_call_operand.hbm [shape: f32[8,16], index: 2, kind: output, shape index: {}]  }
   0x1   :  { %v13_v0 = vld [vmem:[%s209_s1] sm:$0xff]  ;;  %v14_v1 = vld [vmem:[%s209_s1 + $0x8] sm:$0xff]  ;;  %v15_v2 = vld [vmem:[%s209_s1 + $0x10] sm:$0xff]  ;;  %126 = vmatprep.subr.bf16.mxu0 %v162_v3  ;;  %123 = vmatprep.mubr.msk.f32.mxu0 %vm163_vm0, %v164_v6 }
   0x2   :  { %v127_v4 = vpack.c.bf16 %v14_v1, %v13_v0  ;;  %v16_v5 = vld [vmem:[%s209_s1 + $0x18] sm:$0xff] }
   0x3   :  { %7 = vsyncpa [#allocation3], 0  ;;  %v130_v7 = vpack.c.bf16 %v16_v5, %v15_v2  ;;  %v12_v8 = vld [vmem:[%s208_s0] sm:$0xff]  ;;  %vm17_vm1 = vcmask 261120   ;;  %s165_s19 = smov [#allocation2]   ;;  %vm93_vm2 = vcmask 130048  }
   0x4   :  { %128 = vmatpush3.bf16.msra.mxu0 %v127_v4  ;;  %s101_s1 = sshll.u32 %s165_s19, 4  ;;  %s102_s1 = int_to_ptr.vmem [resolvable:$true] %s101_s1 }
   0x5   :  { %129 = vmatprep.subr.bf16.mxu0 %v162_v3  ;;  %s138_s20 = scalar_lea.vmem %s102_s1, 128  ;;  %p143_p1 = scmp.lt.s32.totalorder %s102_s1, %s102_s1 }
   0x6   :  { %p139_p0 = scmp.ne.s32.totalorder %s102_s1, %s138_s20  ;;  %p144_p2 = scmp.lt.s32.totalorder %s138_s20, %s138_s20 }
   0x8   :  { %131 = vmatpush3.bf16.msra.mxu0 %v130_v7  ;;  %p145_p3 = por %p144_p2, %p143_p1 }
   0xa   :  { %p146_p4 = pnand %p145_p3, %p139_p0 }
   0xb   :  { %124 = vmatmul.mubr.msk.f32.vlgmr.msra.gmra.mrb[0].mxu0 %vm17_vm1, %v12_v8 }
  0xde   :  { %v87_v9 = vpop.f32.mrb[0].mxu0 }
  0xdf   :  { %v91_v10 = vmul.f32 1.442695, %v87_v9  ;;  %v125_v11 = vpop.f32.mrb[1].mxu0 }
  0xe1   :  { %136 = vpow2.f32 %v91_v10 }
  0xeb   :  { %v137_v12 = vpop.eup %136 }
  0xec   :  { %94 = vst.msk [vmem:[#allocation2] sm:$0xff] %vm93_vm2, %v137_v12 }
  0xed   :  { %149 = shalt.err (!%p146_p4)
}
  0xee   :  { %s150_s22 = scalar_lea.hbm %s210_s2, 128 }
  0xef   :  { %p151_p5 = scmp.ne.s32.totalorder %s210_s2, %s150_s22  ;;  %p154_p6 = scmp.lt.u32.totalorder %s150_s22, %s210_s2 }
  0xf1   :  { %p156_p7 = pnand %p154_p6, %p151_p5 }
  0xf3   :  { %159 = shalt.err (!%p156_p7)
}
  0xf4   :  { %104 = dma.vmem_to_hbm [thread:$0]  %s102_s1, 128, %s210_s2, [#allocation3]  }
  0xf5   :  { %160 = dma.done.wait [#allocation3], 128  }
  0xf6   :  { %161 = vsyncadd [#allocation3], 4294967168 }
  0xf7   :  { %108 = vsyncpa [#allocation3], 1 }

</bundles_post_ra>
